<compile_context>
chip_gen: v7x
topology: tpu7x:2x2x1
jax: 0.10.0
libtpu: 0.0.40
codegen_flags: <defaults>
</compile_context>

<pallas_src>
import functools

import jax
import jax.numpy as jnp
from jax import lax
from jax.experimental import pallas as pl
from jax.experimental.pallas import tpu as pltpu

_EPS = 1e-12           # torch.nn.functional.normalize default eps
_EPS2 = _EPS * _EPS    # clamp on the sum-of-squares; keep the clamp in f32


def _vmem_capacity_bytes() -> int:
    """Per-core VMEM capacity; conservative fallback if the query is unavailable."""
    try:
        return int(pltpu.get_tpu_info().vmem_capacity_bytes)
    except Exception:
        return 64 * 1024 * 1024  # v7x per-TC VMEM (smallest current generation)


# -----------------------------------------------------------------------------
# Monolithic resident-tile kernel (C fits in VMEM): one DMA in, one fused pass,
# one XLU transpose, one DMA out.  No MXU work (eye @ W.T == W.T is algebraic).
# -----------------------------------------------------------------------------
def _noise_matrix_kernel(w_ref, o_ref, *, scale: float):
    w = w_ref[...].astype(jnp.float32)       # in-kernel upcast (free VPU work)
    w2 = w * w

    # Inverse row norms of W == inverse column norms of W.T (F.normalize dim=0).
    # x / max(||x||, eps) == x * rsqrt(max(sum(x^2), eps^2))   (EUP rsqrt)
    row_ss = jnp.sum(w2, axis=1, keepdims=True)                        # (C, 1)
    inv_row = lax.rsqrt(jnp.maximum(row_ss, _EPS2))

    # Column sum-of-squares of the row-normalized matrix WITHOUT materializing it.
    col_ss = jnp.sum(w2 * (inv_row * inv_row), axis=0, keepdims=True)  # (1, C)
    inv_col = lax.rsqrt(jnp.maximum(col_ss, _EPS2))
    if scale != 1.0:                     # static Python check on the kwarg
        inv_col = inv_col * scale        # fold scale into the inverse norm

    b = (w * inv_row) * inv_col          # single fused output pass over the tile
    o_ref[...] = b.T.astype(o_ref.dtype)  # out = (B*scale).T : XLU transpose


# -----------------------------------------------------------------------------
# Two-pass tiled path (large C / small-VMEM generations such as v7x).
# -----------------------------------------------------------------------------
def _colss_kernel(w_ref, colss_ref):
    """Pass 1: accumulate per-column sum-of-squares of the row-normalized W."""
    w = w_ref[...].astype(jnp.float32)
    w2 = w * w
    row_ss = jnp.sum(w2, axis=1, keepdims=True)
    inv_row = lax.rsqrt(jnp.maximum(row_ss, _EPS2))
    partial = jnp.sum(w2 * (inv_row * inv_row), axis=0, keepdims=True)  # (1, C)

    @pl.when(pl.program_id(0) == 0)
    def _():
        colss_ref[...] = jnp.zeros_like(colss_ref)

    colss_ref[...] += partial


def _apply_kernel(colss_ref, w_ref, o_ref, *, scale: float):
    """Pass 2: re-stream row tiles, apply both inverse norms + scale, transpose."""
    w = w_ref[...].astype(jnp.float32)
    row_ss = jnp.sum(w * w, axis=1, keepdims=True)
    inv_row = lax.rsqrt(jnp.maximum(row_ss, _EPS2))            # recomputed (cheap)
    inv_col = lax.rsqrt(jnp.maximum(colss_ref[...], _EPS2))
    if scale != 1.0:
        inv_col = inv_col * scale
    b = (w * inv_row) * inv_col                                 # (TR, C)
    o_ref[...] = b.T.astype(o_ref.dtype)                        # output col tile (C, TR)


def _monolithic_call(w, out_dtype, scale, vmem_limit, cp):
    spec = pl.BlockSpec(memory_space=pltpu.MemorySpace.VMEM)
    itm_in = jnp.dtype(w.dtype).itemsize
    itm_out = jnp.dtype(out_dtype).itemsize
    cost = pl.CostEstimate(
        flops=6 * cp * cp,
        transcendentals=2 * cp,
        bytes_accessed=cp * cp * (itm_in + itm_out),
    )
    return pl.pallas_call(
        functools.partial(_noise_matrix_kernel, scale=scale),
        out_shape=jax.ShapeDtypeStruct((cp, cp), out_dtype),
        in_specs=[spec],
        out_specs=spec,
        compiler_params=pltpu.CompilerParams(vmem_limit_bytes=vmem_limit),
        cost_estimate=cost,
    )(w)


def _tiled_call(w, out_dtype, scale, budget, cp, row_tile=None):
    itm_in = jnp.dtype(w.dtype).itemsize
    itm_out = jnp.dtype(out_dtype).itemsize

    def _need(tr):
        # double-buffered in + out tiles, ~3 f32 temps, col_ss, headroom
        return tr * cp * (2 * itm_in + 2 * itm_out + 12) + cp * 4 + (2 << 20)

    if row_tile is None:
        row_tile = 128
        for tr in (512, 256, 128):
            if cp % tr == 0 and _need(tr) <= budget:
                row_tile = tr
                break
    assert row_tile % 128 == 0 and cp % row_tile == 0
    nt = cp // row_tile
    vmem_limit = min(max(_need(row_tile), 32 << 20), budget)

    # Pass 1: per-column sum-of-squares of the row-normalized matrix (accumulator).
    colss = pl.pallas_call(
        _colss_kernel,
        out_shape=jax.ShapeDtypeStruct((1, cp), jnp.float32),
        grid=(nt,),
        in_specs=[pl.BlockSpec((row_tile, cp), lambda i: (i, 0))],
        out_specs=pl.BlockSpec((1, cp), lambda i: (0, 0)),
        compiler_params=pltpu.CompilerParams(
            dimension_semantics=("arbitrary",),
            vmem_limit_bytes=vmem_limit),
        cost_estimate=pl.CostEstimate(
            flops=4 * cp * cp, transcendentals=cp,
            bytes_accessed=cp * cp * itm_in + cp * 4),
    )(w)

    # Pass 2: row tile i of W becomes column tile i of the (transposed) output.
    return pl.pallas_call(
        functools.partial(_apply_kernel, scale=scale),
        out_shape=jax.ShapeDtypeStruct((cp, cp), out_dtype),
        grid=(nt,),
        in_specs=[pl.BlockSpec((1, cp), lambda i: (0, 0)),
                  pl.BlockSpec((row_tile, cp), lambda i: (i, 0))],
        out_specs=pl.BlockSpec((cp, row_tile), lambda i: (0, i)),
        compiler_params=pltpu.CompilerParams(
            dimension_semantics=("parallel",),   # shard row tiles across TCs (v7x)
            vmem_limit_bytes=vmem_limit),
        cost_estimate=pl.CostEstimate(
            flops=5 * cp * cp, transcendentals=2 * cp,
            bytes_accessed=cp * cp * (itm_in + itm_out) + cp * 4),
    )(colss, w)


def noise_matrix_layer(weight: jax.Array, scale: float = 1.0, *,
                       force_tiled: bool = False, row_tile=None) -> jax.Array:
    """Pallas implementation of NoiseMatrixLayer.forward (the x argument is unused).

    `weight` follows the PyTorch nn.Linear convention (out_features, in_features).
    The weight is fed to the kernel directly (no wrapper transpose/cast); so no
    input_output_aliases is used (it would clobber the parameter).
    """
    num_classes = weight.shape[0]
    assert weight.shape == (num_classes, num_classes)
    out_dtype = weight.dtype

    # Lane-dense padding: zero rows/columns are inert under both normalizations
    # (0 * rsqrt(max(0, eps^2)) == 0), so pad to a multiple of 128 and slice back.
    cp = ((num_classes + 127) // 128) * 128
    w = weight
    if cp != num_classes:
        w = jnp.pad(weight, ((0, cp - num_classes), (0, cp - num_classes)))

    itm_in = jnp.dtype(w.dtype).itemsize
    itm_out = jnp.dtype(out_dtype).itemsize
    budget = int(_vmem_capacity_bytes() * 0.85)   # never request the whole VMEM

    # Resident-tile requirement: input + output + ~3 f32 temps + headroom.
    resident = cp * cp * (itm_in + itm_out + 12) + (2 << 20)

    if force_tiled or resident > budget:
        out = _tiled_call(w, out_dtype, float(scale), budget, cp, row_tile)
    else:
        out = _monolithic_call(w, out_dtype, float(scale),
                               min(max(resident, 32 << 20), budget), cp)

    if cp != num_classes:
        out = out[:num_classes, :num_classes]
    return out


def _reference(weight: jnp.ndarray, scale: float) -> jnp.ndarray:
    """Pure-JAX reference mirroring the PyTorch forward exactly."""
    m = jnp.eye(weight.shape[0], dtype=jnp.float32) @ weight.astype(jnp.float32).T
    m = m / jnp.maximum(jnp.linalg.norm(m, axis=0, keepdims=True), _EPS)
    m = m / jnp.maximum(jnp.linalg.norm(m, axis=1, keepdims=True), _EPS)
    return m * scale


if __name__ == "__main__":
    num_classes = 16
    key = jax.random.PRNGKey(0)
    k_w, k_w2, k_x = jax.random.split(key, 3)

    # x is accepted by forward() but never used; build it anyway for fidelity.
    x = jax.random.normal(k_x, (2, num_classes), dtype=jnp.float32)  # unused

    # Case 1: module init (weight = identity), scale=1  -> monolithic path.
    weight_eye = jnp.eye(num_classes, dtype=jnp.float32)
    out1 = jax.block_until_ready(noise_matrix_layer(weight_eye, scale=1.0))
    ref1 = _reference(weight_eye, 1.0)
    assert out1.shape == (num_classes, num_classes)
    assert jnp.allclose(out1, ref1, atol=1e-5, rtol=1e-5)

    # Case 2: random weight, scale != 1 (folded-scale path) -> monolithic path.
    weight_rnd = jax.random.normal(k_w, (num_classes, num_classes), dtype=jnp.float32)
    out2 = jax.block_until_ready(noise_matrix_layer(weight_rnd, scale=2.5))
    ref2 = _reference(weight_rnd, 2.5)
    assert jnp.allclose(out2, ref2, atol=1e-5, rtol=1e-5)

    # Case 3: non-multiple-of-128 size (padding path) + forced two-pass tiled kernel
    # with 2 row tiles; also cross-check tiled vs monolithic on the same input.
    c_big = 200
    weight_big = jax.random.normal(k_w2, (c_big, c_big), dtype=jnp.float32)
    out3_tiled = jax.block_until_ready(
        noise_matrix_layer(weight_big, scale=0.5, force_tiled=True, row_tile=128))
    out3_mono = jax.block_until_ready(noise_matrix_layer(weight_big, scale=0.5))
    ref3 = _reference(weight_big, 0.5)
    assert jnp.allclose(out3_tiled, ref3, atol=1e-5, rtol=1e-5)
    assert jnp.allclose(out3_mono, ref3, atol=1e-5, rtol=1e-5)
    assert jnp.allclose(out3_tiled, out3_mono, atol=1e-5, rtol=1e-5)

    print("KERNEL_OK")
</pallas_src>

<mosaic_0001>
module attributes {stable_mosaic.version = 11 : i64} {
  func.func @_noise_matrix_kernel(%arg0: memref<128x128xf32, #tpu.memory_space<vmem>>, %arg1: memref<128x128xf32, #tpu.memory_space<vmem>>) attributes {dimension_semantics = [], scalar_prefetch = 0 : i64, scratch_operands = 0 : i64, tpu.core_type = #tpu.core_type<tc>} {
    %c0 = arith.constant 0 : index
    %c0_0 = arith.constant 0 : index
    %0 = vector.load %arg0[%c0, %c0_0] : memref<128x128xf32, #tpu.memory_space<vmem>>, vector<128x128xf32>
    %1 = arith.mulf %0, %0 : vector<128x128xf32>
    %cst = arith.constant dense<0.000000e+00> : vector<128xf32>
    %2 = vector.multi_reduction <add>, %1, %cst [1] : vector<128x128xf32> to vector<128xf32>
    %3 = vector.shape_cast %2 : vector<128xf32> to vector<128x1xf32>
    %cst_1 = arith.constant 1.000000e-24 : f32
    %4 = vector.broadcast %cst_1 : f32 to vector<128x1xf32>
    %5 = arith.maximumf %3, %4 : vector<128x1xf32>
    %6 = math.rsqrt %5 : vector<128x1xf32>
    %7 = arith.mulf %6, %6 : vector<128x1xf32>
    %8 = vector.broadcast %7 : vector<128x1xf32> to vector<128x128xf32>
    %9 = arith.mulf %1, %8 : vector<128x128xf32>
    %cst_2 = arith.constant dense<0.000000e+00> : vector<128xf32>
    %10 = vector.multi_reduction <add>, %9, %cst_2 [0] : vector<128x128xf32> to vector<128xf32>
    %11 = vector.shape_cast %10 : vector<128xf32> to vector<1x128xf32>
    %cst_3 = arith.constant 1.000000e-24 : f32
    %12 = vector.broadcast %cst_3 : f32 to vector<1x128xf32>
    %13 = arith.maximumf %11, %12 : vector<1x128xf32>
    %14 = math.rsqrt %13 : vector<1x128xf32>
    %15 = vector.broadcast %6 : vector<128x1xf32> to vector<128x128xf32>
    %16 = arith.mulf %0, %15 : vector<128x128xf32>
    %17 = vector.broadcast %14 : vector<1x128xf32> to vector<128x128xf32>
    %18 = arith.mulf %16, %17 : vector<128x128xf32>
    %19 = tpu.transpose %18, [1, 0] : vector<128x128xf32> -> vector<128x128xf32>
    %c0_4 = arith.constant 0 : index
    %c0_5 = arith.constant 0 : index
    %20 = vector.load %arg1[%c0_4, %c0_5] : memref<128x128xf32, #tpu.memory_space<vmem>>, vector<128x128xf32>
    tpu.vector_store %arg1[%c0_4, %c0_5], %19 {strides = array<i32>} : memref<128x128xf32, #tpu.memory_space<vmem>>, vector<128x128xf32>,
    return
  }
}

</mosaic_0001>

<bundles_post_ra>
// kernel: tpu_custom_call.1
= control target key start
LH: loop header
LB: loop body
LE: loop exit
PB: predicated region body
PF: predicated region fallthrough
CT: control target
= control target key end

     0   :  { %6 = vsyncpa [#allocation3], 0  ;;  %s615_s0 = inlined_call_operand.hbm [shape: f32[128,128], index: 0, kind: input, shape index: {}]   ;;  %s616_s1 = inlined_call_operand.hbm [shape: f32[128,128], index: 1, kind: output, shape index: {}]  }
   0x1   :  { %7 = vsyncpa [#allocation4], 0  ;;  %s357_s6 = smov [#allocation2]   ;;  %s309_s10 = scalar_lea.hbm %s615_s0, 2048 }
   0x2   :  { %s13_s7 = sshll.u32 %s357_s6, 4  ;;  %p310_p0 = scmp.ne.s32.totalorder %s615_s0, %s309_s10  ;;  %s14_s7 = int_to_ptr.vmem [resolvable:$true] %s13_s7 }
   0x3   :  { %p313_p1 = scmp.lt.u32.totalorder %s309_s10, %s615_s0 }
   0x5   :  { %p315_p2 = pnand %p313_p1, %p310_p0 }
   0x7   :  { %318 = shalt.err (!%p315_p2)
}
   0x8   :  { %s319_s15 = scalar_lea.vmem %s14_s7, 2048  ;;  %p324_p4 = scmp.lt.s32.totalorder %s14_s7, %s14_s7 }
   0x9   :  { %p320_p3 = scmp.ne.s32.totalorder %s14_s7, %s319_s15  ;;  %p325_p5 = scmp.lt.s32.totalorder %s319_s15, %s319_s15 }
   0xb   :  { %p326_p6 = por %p325_p5, %p324_p4 }
   0xd   :  { %p327_p7 = pnand %p326_p6, %p320_p3 }
   0xf   :  { %330 = shalt.err (!%p327_p7)
}
  0x10   :  { %s358_s16 = smov 128   ;;  %s359_s17 = smov 8  }
  0x11   :  { %19 = dma.hbm_to_vmem [thread:$0]  %s615_s0, 2048, %s14_s7, [#allocation3], %s358_s16, %s358_s16, %s359_s17  }
  0x12   :  { %353 = dma.done.wait [#allocation3], 2048  }
  0x13   :  { %354 = vsyncadd [#allocation3], 4294965248  ;;  %v386_v0 = vld [vmem:[#allocation2] sm:$0xff]  ;;  %v388_v1 = vld [vmem:[#allocation2 + $0x10] sm:$0xff]  ;;  %s360_s0 = smov [#allocation5]  }
  0x14   :  { %v390_v2 = vld [vmem:[#allocation2 + $0x8] sm:$0xff]  ;;  %v394_v3 = vmul.f32 %v386_v0, %v386_v0  ;;  %v398_v4 = vmul.f32 %v388_v1, %v388_v1  ;;  %v400_v5 = vld [vmem:[#allocation2 + $0x18] sm:$0xff]  ;;  %v412_v8 = vld [vmem:[#allocation2 + $0x20] sm:$0xff]  ;;  %s259_s20 = sshll.u32 %s360_s0, 4  ;;  %s260_s20 = int_to_ptr.vmem [resolvable:$true] %s259_s20 }
  0x15   :  { %v406_v6 = vmul.f32 %v390_v2, %v390_v2  ;;  %v410_v7 = vmul.f32 %v400_v5, %v400_v5  ;;  %v414_v9 = vld [vmem:[#allocation2 + $0x28] sm:$0xff]  ;;  %v420_v10 = vmul.f32 %v412_v8, %v412_v8  ;;  %v426_v12 = vld [vmem:[#allocation2 + $0x30] sm:$0xff]  ;;  %v428_v13 = vld [vmem:[#allocation2 + $0x38] sm:$0xff]  ;;  %s331_s21 = scalar_lea.vmem %s260_s20, 2048  ;;  %p336_p9 = scmp.lt.s32.totalorder %s260_s20, %s260_s20 }
  0x16   :  { %55 = vadd.xlane.f32.xlu0 %v394_v3  ;;  %59 = vadd.xlane.f32.xlu1 %v398_v4  ;;  %v424_v11 = vmul.f32 %v414_v9, %v414_v9  ;;  %v434_v14 = vmul.f32 %v426_v12, %v426_v12  ;;  %v438_v15 = vmul.f32 %v428_v13, %v428_v13  ;;  %v440_v16 = vld [vmem:[#allocation2 + $0x40] sm:$0xff]  ;;  %v442_v17 = vld [vmem:[#allocation2 + $0x48] sm:$0xff]  ;;  %v454_v20 = vld [vmem:[#allocation2 + $0x50] sm:$0xff]  ;;  %p332_p8 = scmp.ne.s32.totalorder %s260_s20, %s331_s21  ;;  %p337_p10 = scmp.lt.s32.totalorder %s331_s21, %s331_s21 }
  0x17   :  { %v448_v18 = vmul.f32 %v440_v16, %v440_v16  ;;  %v452_v19 = vmul.f32 %v442_v17, %v442_v17  ;;  %v456_v21 = vld [vmem:[#allocation2 + $0x58] sm:$0xff]  ;;  %v462_v22 = vmul.f32 %v454_v20, %v454_v20  ;;  %v468_v24 = vld [vmem:[#allocation2 + $0x60] sm:$0xff]  ;;  %v470_v25 = vld [vmem:[#allocation2 + $0x68] sm:$0xff] }
  0x18   :  { %v466_v23 = vmul.f32 %v456_v21, %v456_v21  ;;  %v476_v26 = vmul.f32 %v468_v24, %v468_v24  ;;  %v480_v27 = vmul.f32 %v470_v25, %v470_v25  ;;  %v482_v28 = vld [vmem:[#allocation2 + $0x70] sm:$0xff]  ;;  %v484_v29 = vld [vmem:[#allocation2 + $0x78] sm:$0xff]  ;;  %p338_p11 = por %p337_p10, %p336_p9 }
  0x19   :  { %v490_v30 = vmul.f32 %v482_v28, %v482_v28  ;;  %v494_v31 = vmul.f32 %v484_v29, %v484_v29 }
  0x1a   :  { %57 = vadd.xlane.f32.xlu0 %v406_v6  ;;  %61 = vadd.xlane.f32.xlu1 %v410_v7  ;;  %p339_p12 = pnand %p338_p11, %p332_p8 }
  0x1e   :  { %63 = vadd.xlane.f32.xlu0 %v420_v10  ;;  %65 = vadd.xlane.f32.xlu1 %v424_v11 }
  0x22   :  { %67 = vadd.xlane.f32.xlu0 %v434_v14  ;;  %69 = vadd.xlane.f32.xlu1 %v438_v15 }
  0x26   :  { %71 = vadd.xlane.f32.xlu0 %v448_v18  ;;  %73 = vadd.xlane.f32.xlu1 %v452_v19 }
  0x2a   :  { %75 = vadd.xlane.f32.xlu0 %v462_v22  ;;  %77 = vadd.xlane.f32.xlu1 %v466_v23 }
  0x2e   :  { %79 = vadd.xlane.f32.xlu0 %v476_v26  ;;  %81 = vadd.xlane.f32.xlu1 %v480_v27 }
  0x32   :  { %83 = vadd.xlane.f32.xlu0 %v490_v30  ;;  %85 = vadd.xlane.f32.xlu1 %v494_v31 }
  0xa3   :  { %v56_v32 = vpop.xlane.xlu0 %55  ;;  %v60_v33 = vpop.xlane.xlu1 %59 }
  0xa4   :  { %v87_v34 = vmax.f32 %v56_v32, 1e-24  ;;  %v89_v35 = vmax.f32 %v60_v33, 1e-24 }
  0xa6   :  { %275 = vrsqrt.f32 %v87_v34 }
  0xa7   :  { %v58_v36 = vpop.xlane.xlu0 %57  ;;  %v62_v37 = vpop.xlane.xlu1 %61  ;;  %277 = vrsqrt.f32 %v89_v35 }
  0xa8   :  { %v88_v38 = vmax.f32 %v58_v36, 1e-24  ;;  %v90_v39 = vmax.f32 %v62_v37, 1e-24 }
  0xaa   :  { %279 = vrsqrt.f32 %v88_v38 }
  0xab   :  { %281 = vrsqrt.f32 %v90_v39  ;;  %v64_v40 = vpop.xlane.xlu0 %63  ;;  %v66_v41 = vpop.xlane.xlu1 %65 }
  0xac   :  { %v91_v42 = vmax.f32 %v64_v40, 1e-24  ;;  %v92_v43 = vmax.f32 %v66_v41, 1e-24 }
  0xae   :  { %283 = vrsqrt.f32 %v91_v42 }
  0xaf   :  { %285 = vrsqrt.f32 %v92_v43  ;;  %v68_v44 = vpop.xlane.xlu0 %67  ;;  %v70_v45 = vpop.xlane.xlu1 %69 }
  0xb0   :  { %v498_v46 = vpop.eup %275  ;;  %v93_v47 = vmax.f32 %v68_v44, 1e-24  ;;  %v94_v48 = vmax.f32 %v70_v45, 1e-24 }
  0xb1   :  { %v500_v49 = vpop.eup %277  ;;  %v119_v50 = vmul.f32 %v498_v46, %v498_v46 }
  0xb2   :  { %287 = vrsqrt.f32 %v93_v47  ;;  %v121_v57 = vmul.f32 %v500_v49, %v500_v49 }
  0xb3   :  { %289 = vrsqrt.f32 %v94_v48  ;;  %v72_v51 = vpop.xlane.xlu0 %71  ;;  %v74_v52 = vpop.xlane.xlu1 %73  ;;  %v135_v60 = vmul.f32 %v119_v50, %v394_v3 }
  0xb4   :  { %v504_v53 = vpop.eup %279  ;;  %v95_v54 = vmax.f32 %v72_v51, 1e-24  ;;  %v96_v55 = vmax.f32 %v74_v52, 1e-24  ;;  %v137_v36 = vmul.f32 %v121_v57, %v398_v4 }
  0xb5   :  { %v506_v56 = vpop.eup %281  ;;  %v120_v58 = vmul.f32 %v504_v53, %v504_v53 }
  0xb6   :  { %v122_v59 = vmul.f32 %v506_v56, %v506_v56  ;;  %291 = vrsqrt.f32 %v95_v54 }
  0xb7   :  { %v136_v61 = vmul.f32 %v120_v58, %v406_v6  ;;  %293 = vrsqrt.f32 %v96_v55  ;;  %v76_v62 = vpop.xlane.xlu0 %75  ;;  %v78_v63 = vpop.xlane.xlu1 %77 }
  0xb8   :  { %v516_v32 = vpop.eup %283  ;;  %v97_v33 = vmax.f32 %v76_v62, 1e-24  ;;  %v98_v34 = vmax.f32 %v78_v63, 1e-24  ;;  %v138_v38 = vmul.f32 %v122_v59, %v410_v7 }
  0xb9   :  { %v518_v35 = vpop.eup %285  ;;  %v151_v37 = vadd.f32 %v136_v61, %v135_v60  ;;  %v123_v39 = vmul.f32 %v516_v32, %v516_v32 }
  0xba   :  { %v124_v3 = vmul.f32 %v518_v35, %v518_v35  ;;  %295 = vrsqrt.f32 %v97_v33 }
  0xbb   :  { %v152_v6 = vadd.f32 %v151_v37, %v137_v36  ;;  %v139_v40 = vmul.f32 %v123_v39, %v420_v10  ;;  %297 = vrsqrt.f32 %v98_v34  ;;  %v80_v41 = vpop.xlane.xlu0 %79  ;;  %v82_v42 = vpop.xlane.xlu1 %81 }
  0xbc   :  { %v527_v43 = vpop.eup %287  ;;  %v99_v44 = vmax.f32 %v80_v41, 1e-24  ;;  %v100_v4 = vmax.f32 %v82_v42, 1e-24  ;;  %v140_v47 = vmul.f32 %v124_v3, %v424_v11 }
  0xbd   :  { %v529_v45 = vpop.eup %289  ;;  %v153_v7 = vadd.f32 %v152_v6, %v138_v38  ;;  %v125_v48 = vmul.f32 %v527_v43, %v527_v43 }
  0xbe   :  { %v126_v50 = vmul.f32 %v529_v45, %v529_v45  ;;  %299 = vrsqrt.f32 %v99_v44 }
  0xbf   :  { %v154_v10 = vadd.f32 %v153_v7, %v139_v40  ;;  %v141_v51 = vmul.f32 %v125_v48, %v434_v14  ;;  %301 = vrsqrt.f32 %v100_v4  ;;  %v84_v52 = vpop.xlane.xlu0 %83  ;;  %v86_v54 = vpop.xlane.xlu1 %85 }
  0xc0   :  { %v537_v55 = vpop.eup %291  ;;  %v101_v57 = vmax.f32 %v84_v52, 1e-24  ;;  %v102_v58 = vmax.f32 %v86_v54, 1e-24  ;;  %v142_v60 = vmul.f32 %v126_v50, %v438_v15 }
  0xc1   :  { %v539_v59 = vpop.eup %293  ;;  %v155_v11 = vadd.f32 %v154_v10, %v140_v47  ;;  %v127_v61 = vmul.f32 %v537_v55, %v537_v55 }
  0xc2   :  { %v128_v62 = vmul.f32 %v539_v59, %v539_v59  ;;  %303 = vrsqrt.f32 %v101_v57 }
  0xc3   :  { %v156_v14 = vadd.f32 %v155_v11, %v141_v51  ;;  %v143_v63 = vmul.f32 %v127_v61, %v448_v18  ;;  %305 = vrsqrt.f32 %v102_v58 }
  0xc4   :  { %v547_v33 = vpop.eup %295  ;;  %v144_v37 = vmul.f32 %v128_v62, %v452_v19 }
  0xc5   :  { %v549_v34 = vpop.eup %297  ;;  %v157_v36 = vadd.f32 %v156_v14, %v142_v60  ;;  %v129_v15 = vmul.f32 %v547_v33, %v547_v33 }
  0xc6   :  { %v130_v38 = vmul.f32 %v549_v34, %v549_v34 }
  0xc7   :  { %v158_v39 = vadd.f32 %v157_v36, %v143_v63  ;;  %v145_v3 = vmul.f32 %v129_v15, %v462_v22 }
  0xc8   :  { %v557_v6 = vpop.eup %299  ;;  %v146_v41 = vmul.f32 %v130_v38, %v466_v23 }
  0xc9   :  { %v559_v18 = vpop.eup %301  ;;  %v159_v40 = vadd.f32 %v158_v39, %v144_v37  ;;  %v131_v42 = vmul.f32 %v557_v6, %v557_v6 }
  0xca   :  { %v132_v19 = vmul.f32 %v559_v18, %v559_v18 }
  0xcb   :  { %v160_v44 = vadd.f32 %v159_v40, %v145_v3  ;;  %v147_v4 = vmul.f32 %v131_v42, %v476_v26  ;;  %v176_v40 = vmul.f32 %v500_v49, %v388_v1  ;;  %v180_v1 = vmul.f32 %v527_v43, %v426_v12 }
  0xcc   :  { %v304_v7 = vpop.eup %303  ;;  %v148_v22 = vmul.f32 %v132_v19, %v480_v27  ;;  %v174_v27 = vmul.f32 %v498_v46, %v386_v0  ;;  %v177_v0 = vmul.f32 %v506_v56, %v400_v5  ;;  %v181_v5 = vmul.f32 %v529_v45, %v428_v13 }
  0xcd   :  { %v306_v47 = vpop.eup %305  ;;  %v161_v48 = vadd.f32 %v160_v44, %v146_v41  ;;  %v133_v50 = vmul.f32 %v304_v7, %v304_v7  ;;  %v184_v12 = vmul.f32 %v547_v33, %v454_v20  ;;  %v185_v13 = vmul.f32 %v549_v34, %v456_v21 }
  0xce   :  { %v134_v10 = vmul.f32 %v306_v47, %v306_v47  ;;  %v189_v15 = vmul.f32 %v306_v47, %v484_v29 }
  0xcf   :  { %v162_v51 = vadd.f32 %v161_v48, %v147_v4  ;;  %v149_v52 = vmul.f32 %v133_v50, %v490_v30  ;;  %v188_v30 = vmul.f32 %v304_v7, %v482_v28  ;;  %v178_v28 = vmul.f32 %v516_v32, %v412_v8 }
  0xd0   :  { %v150_v54 = vmul.f32 %v134_v10, %v494_v31  ;;  %v175_v31 = vmul.f32 %v504_v53, %v390_v2  ;;  %v179_v2 = vmul.f32 %v518_v35, %v414_v9  ;;  %v182_v8 = vmul.f32 %v537_v55, %v440_v16 }
  0xd1   :  { %v163_v23 = vadd.f32 %v162_v51, %v148_v22  ;;  %v183_v9 = vmul.f32 %v539_v59, %v442_v17  ;;  %v186_v16 = vmul.f32 %v557_v6, %v468_v24  ;;  %v187_v17 = vmul.f32 %v559_v18, %v470_v25 }
  0xd3   :  { %v164_v57 = vadd.f32 %v163_v23, %v149_v52 }
  0xd5   :  { %v165_v58 = vadd.f32 %v164_v57, %v150_v54 }
  0xd7   :  { %v166_v11 = vrot.slane %v165_v58, 4 }
  0xd9   :  { %v167_v60 = vadd.f32 %v166_v11, %v165_v58 }
  0xdb   :  { %v168_v61 = vrot.slane %v167_v60, 2 }
  0xdd   :  { %v169_v62 = vadd.f32 %v168_v61, %v167_v60 }
  0xdf   :  { %v170_v26 = vrot.slane %v169_v62, 1 }
  0xe1   :  { %v171_v14 = vadd.f32 %v170_v26, %v169_v62 }
  0xe3   :  { %v172_v63 = vmax.f32 %v171_v14, 1e-24 }
  0xe5   :  { %307 = vrsqrt.f32 %v172_v63 }
  0xef   :  { %v308_v36 = vpop.eup %307 }
  0xf0   :  { %v190_v37 = vmul.f32 %v308_v36, %v174_v27  ;;  %v204_v38 = vmul.f32 %v308_v36, %v188_v30  ;;  %v205_v39 = vmul.f32 %v308_v36, %v189_v15  ;;  %v191_v3 = vmul.f32 %v308_v36, %v175_v31 }
  0xf1   :  { %v192_v41 = vmul.f32 %v308_v36, %v176_v40  ;;  %v193_v46 = vmul.f32 %v308_v36, %v177_v0  ;;  %v194_v29 = vmul.f32 %v308_v36, %v178_v28  ;;  %v195_v53 = vmul.f32 %v308_v36, %v179_v2 }
  0xf2   :  { %206 = vxpose.xlu0.b32.start [1/16] %v190_v37, 128  ;;  %v196_v49 = vmul.f32 %v308_v36, %v180_v1  ;;  %v197_v56 = vmul.f32 %v308_v36, %v181_v5  ;;  %v198_v32 = vmul.f32 %v308_v36, %v182_v8  ;;  %v199_v35 = vmul.f32 %v308_v36, %v183_v9 }
  0xf3   :  { %v200_v43 = vmul.f32 %v308_v36, %v184_v12  ;;  %v201_v45 = vmul.f32 %v308_v36, %v185_v13  ;;  %v202_v55 = vmul.f32 %v308_v36, %v186_v16  ;;  %v203_v59 = vmul.f32 %v308_v36, %v187_v17 }
  0xf6   :  { %207 = vxpose.xlu0.b32.cont [2/16] %v191_v3, 128 }
  0xfa   :  { %208 = vxpose.xlu0.b32.cont [3/16] %v192_v41, 128 }
  0xfe   :  { %209 = vxpose.xlu0.b32.cont [4/16] %v193_v46, 128 }
 0x102   :  { %210 = vxpose.xlu0.b32.cont [5/16] %v194_v29, 128 }
 0x106   :  { %211 = vxpose.xlu0.b32.cont [6/16] %v195_v53, 128 }
 0x10a   :  { %212 = vxpose.xlu0.b32.cont [7/16] %v196_v49, 128 }
 0x10e   :  { %213 = vxpose.xlu0.b32.cont [8/16] %v197_v56, 128 }
 0x112   :  { %214 = vxpose.xlu0.b32.cont [9/16] %v198_v32, 128 }
 0x116   :  { %215 = vxpose.xlu0.b32.cont [10/16] %v199_v35, 128 }
 0x11a   :  { %216 = vxpose.xlu0.b32.cont [11/16] %v200_v43, 128 }
 0x11e   :  { %217 = vxpose.xlu0.b32.cont [12/16] %v201_v45, 128 }
 0x122   :  { %218 = vxpose.xlu0.b32.cont [13/16] %v202_v55, 128 }
 0x126   :  { %219 = vxpose.xlu0.b32.cont [14/16] %v203_v59, 128 }
 0x12a   :  { %220 = vxpose.xlu0.b32.cont [15/16] %v204_v38, 128 }
 0x12e   :  { %221 = vxpose.xlu0.b32.end [16/16] %v205_v39, 128 }
 0x172   :  { %v222_v20 = vpop.trf.xlu0 }
 0x173   :  { %238 = vst [vmem:[#allocation5] sm:$0xff] %v222_v20 }
 0x176   :  { %v223_v33 = vpop.trf.xlu0 }
 0x177   :  { %239 = vst [vmem:[#allocation5 + $0x8] sm:$0xff] %v223_v33 }
 0x17a   :  { %v224_v42 = vpop.trf.xlu0 }
 0x17b   :  { %240 = vst [vmem:[#allocation5 + $0x10] sm:$0xff] %v224_v42 }
 0x17e   :  { %v225_v21 = vpop.trf.xlu0 }
 0x17f   :  { %241 = vst [vmem:[#allocation5 + $0x18] sm:$0xff] %v225_v21 }
 0x182   :  { %v226_v34 = vpop.trf.xlu0 }
 0x183   :  { %242 = vst [vmem:[#allocation5 + $0x20] sm:$0xff] %v226_v34 }
 0x186   :  { %v227_v24 = vpop.trf.xlu0 }
 0x187   :  { %243 = vst [vmem:[#allocation5 + $0x28] sm:$0xff] %v227_v24 }
 0x18a   :  { %v228_v6 = vpop.trf.xlu0 }
 0x18b   :  { %244 = vst [vmem:[#allocation5 + $0x30] sm:$0xff] %v228_v6 }
 0x18e   :  { %v229_v19 = vpop.trf.xlu0 }
 0x18f   :  { %245 = vst [vmem:[#allocation5 + $0x38] sm:$0xff] %v229_v19 }
 0x192   :  { %v230_v25 = vpop.trf.xlu0 }
 0x193   :  { %246 = vst [vmem:[#allocation5 + $0x40] sm:$0xff] %v230_v25 }
 0x196   :  { %v231_v18 = vpop.trf.xlu0 }
 0x197   :  { %247 = vst [vmem:[#allocation5 + $0x48] sm:$0xff] %v231_v18 }
 0x19a   :  { %v232_v44 = vpop.trf.xlu0 }
 0x19b   :  { %248 = vst [vmem:[#allocation5 + $0x50] sm:$0xff] %v232_v44 }
 0x19e   :  { %v233_v4 = vpop.trf.xlu0 }
 0x19f   :  { %249 = vst [vmem:[#allocation5 + $0x58] sm:$0xff] %v233_v4 }
 0x1a2   :  { %v234_v7 = vpop.trf.xlu0 }
 0x1a3   :  { %250 = vst [vmem:[#allocation5 + $0x60] sm:$0xff] %v234_v7 }
 0x1a6   :  { %v235_v47 = vpop.trf.xlu0 }
 0x1a7   :  { %251 = vst [vmem:[#allocation5 + $0x68] sm:$0xff] %v235_v47 }
 0x1aa   :  { %v236_v48 = vpop.trf.xlu0 }
 0x1ab   :  { %252 = vst [vmem:[#allocation5 + $0x70] sm:$0xff] %v236_v48 }
 0x1ae   :  { %v237_v22 = vpop.trf.xlu0 }
 0x1af   :  { %253 = vst [vmem:[#allocation5 + $0x78] sm:$0xff] %v237_v22 }
 0x1b0   :  { %342 = shalt.err (!%p339_p12)
}
 0x1b1   :  { %s343_s24 = scalar_lea.hbm %s616_s1, 2048 }
 0x1b2   :  { %p344_p13 = scmp.ne.s32.totalorder %s616_s1, %s343_s24  ;;  %p347_p0 = scmp.lt.u32.totalorder %s343_s24, %s616_s1 }
 0x1b4   :  { %p349_p1 = pnand %p347_p0, %p344_p13 }
 0x1b6   :  { %352 = shalt.err (!%p349_p1)
}
 0x1b7   :  { %265 = dma.vmem_to_hbm [thread:$0]  %s260_s20, 2048, %s616_s1, [#allocation4], %s358_s16, %s358_s16, %s359_s17  }
 0x1b8   :  { %355 = dma.done.wait [#allocation4], 2048  }
 0x1b9   :  { %356 = vsyncadd [#allocation4], 4294965248 }
 0x1ba   :  { %269 = vsyncpa [#allocation3], 1 }
 0x1bb   :  { %270 = vsyncpa [#allocation4], 1 }

</bundles_post_ra>
